<compile_context>
chip_gen: v5e
topology: v5e:2x2
jax: 0.10.0
libtpu: 0.0.40
codegen_flags: <defaults>
</compile_context>

<pallas_src>
import jax
import jax.numpy as jnp
from jax.experimental import pallas as pl
from jax.experimental.pallas import tpu as pltpu  # noqa: F401  (TPU backend)

# --- model dimensions (small, synthetic) ---
B = 2          # batch
N = 8          # instances per bag (sequence length)
D = 32         # embedding dim
H = 16         # attention hidden dim
NUM_HEADS = 2  # number of classification heads ("labels")
C = 4          # classes per head


def _calibrated_aggregator_kernel(
    x_ref,        # (B, N, D)            VMEM  f32
    mask_ref,     # (B, N)               VMEM  f32
    attn_v_ref,   # (D, H)               VMEM
    attn_w_ref,   # (1, H)               VMEM
    heads_w_ref,  # (D, NUM_HEADS*C)     VMEM  (calibration pre-folded)
    heads_b_ref,  # (1, NUM_HEADS*C)     VMEM  (calibration pre-folded)
    emb_ref,      # (B, D)               out: backbone_embedding
    heads_ref,    # (B, NUM_HEADS*C)     out: calibrated heads activations (flat)
    attn_ref,     # (B, N)               out: attn_scores
):
    x = x_ref[...]                                    # (B, N, D), already f32
    mask = mask_ref[...]                              # (B, N)

    # --- attention scores: w^T tanh(V^T x_n) ---
    h = jnp.tanh(
        jnp.einsum("bnd,dh->bnh", x, attn_v_ref[...],
                   preferred_element_type=jnp.float32)
    )                                                 # (B, N, H)
    # VPU broadcast-mul + cross-lane reduce instead of a lane-width-1 matmul.
    w = attn_w_ref[...]                               # (1, H)
    s = jnp.sum(h * w[None, :, :], axis=-1)           # (B, N)

    # --- masked softmax over instances ---
    # TODO(synk): a fully padded bag degenerates to a uniform distribution over
    # padding; upstream guarantees >=1 valid instance per bag.
    s = jnp.where(mask > 0.0, s, jnp.float32(-1e30))
    m = jnp.max(s, axis=-1, keepdims=True)
    e = jnp.exp(s - m)
    denom = jnp.sum(e, axis=-1, keepdims=True)
    attn = e * pl.reciprocal(denom, approx=True)      # (B, N)
    attn_ref[...] = attn.astype(attn_ref.dtype)

    # --- attention pooling -> backbone embedding ---
    emb = jnp.sum(attn[..., None] * x, axis=1)        # (B, D)
    emb_ref[...] = emb.astype(emb_ref.dtype)

    # --- fused classification heads (calibration folded into W / b) ---
    logits = jnp.dot(emb, heads_w_ref[...],
                     preferred_element_type=jnp.float32) + heads_b_ref[...]
    heads_ref[...] = logits.astype(heads_ref.dtype)   # (B, NUM_HEADS*C)


def prepare_params(raw):
    """One-time parameter transform: fold Platt calibration into the heads.

    W'[:, h*C + c] = W_h[:, c] * a_h[c]
    b'[h*C + c]    = a_h[c] * b_h[c] + cal_b_h[c]
    """
    heads_w = raw["heads_w"]                          # (NUM_HEADS, D, C)
    heads_b = raw["heads_b"]                          # (NUM_HEADS, C)
    cal_a = raw["cal_a"]                              # (NUM_HEADS, C)
    cal_b = raw["cal_b"]                              # (NUM_HEADS, C)

    w_folded = heads_w * cal_a[:, None, :]            # (NUM_HEADS, D, C)
    w_folded = jnp.transpose(w_folded, (1, 0, 2)).reshape(D, NUM_HEADS * C)
    b_folded = (cal_a * heads_b + cal_b).reshape(1, NUM_HEADS * C)

    return {
        "attn_v": raw["attn_v"],                      # (D, H)
        "attn_w": raw["attn_w"],                      # (1, H)
        "heads_w_folded": w_folded,                   # (D, NUM_HEADS*C)
        "heads_b_folded": b_folded,                   # (1, NUM_HEADS*C)
    }


def calibrated_aggregator_forward(x, padding_masks, prepared):
    """Single-invocation Pallas call; whole problem resident in VMEM."""
    out_shapes = (
        jax.ShapeDtypeStruct((B, D), jnp.float32),              # backbone_embedding
        jax.ShapeDtypeStruct((B, NUM_HEADS * C), jnp.float32),  # heads (flat, lane-dense)
        jax.ShapeDtypeStruct((B, N), jnp.float32),              # attn_scores
    )

    emb, heads_flat, attn = pl.pallas_call(
        _calibrated_aggregator_kernel,
        out_shape=out_shapes,
    )(
        x,
        padding_masks,
        prepared["attn_v"],
        prepared["attn_w"],
        prepared["heads_w_folded"],
        prepared["heads_b_folded"],
    )

    heads_activations = {
        f"label_{i}": heads_flat[:, i * C:(i + 1) * C] for i in range(NUM_HEADS)
    }
    return {
        "backbone_embedding": emb,
        "heads_activations": heads_activations,
        "attn_scores": attn,
    }


def _init_raw_params(key):
    k = jax.random.split(key, 6)
    return {
        "attn_v": jax.random.normal(k[0], (D, H), jnp.float32) * 0.1,
        "attn_w": jax.random.normal(k[1], (1, H), jnp.float32) * 0.1,
        "heads_w": jax.random.normal(k[2], (NUM_HEADS, D, C), jnp.float32) * 0.1,
        "heads_b": jax.random.normal(k[3], (NUM_HEADS, C), jnp.float32) * 0.01,
        # Calibrator (Platt scaling) parameters.
        "cal_a": 1.0 + 0.05 * jax.random.normal(k[4], (NUM_HEADS, C), jnp.float32),
        "cal_b": 0.05 * jax.random.normal(k[5], (NUM_HEADS, C), jnp.float32),
    }


def _reference_forward(x, padding_masks, raw):
    """Pure-JAX reference (unfolded params), mirrors the PyTorch module."""
    h = jnp.tanh(jnp.einsum("bnd,dh->bnh", x, raw["attn_v"]))
    s = jnp.einsum("bnh,h->bn", h, raw["attn_w"][0])
    s = jnp.where(padding_masks > 0.0, s, -1e30)
    attn = jax.nn.softmax(s, axis=-1)
    emb = jnp.einsum("bn,bnd->bd", attn, x)
    heads = {}
    for hh in range(NUM_HEADS):
        logits = emb @ raw["heads_w"][hh] + raw["heads_b"][hh]
        heads[f"label_{hh}"] = raw["cal_a"][hh] * logits + raw["cal_b"][hh]
    return emb, heads, attn


if __name__ == "__main__":
    key = jax.random.PRNGKey(0)
    kx, kp = jax.random.split(key, 2)

    x = jax.random.normal(kx, (B, N, D), jnp.float32)
    # padding mask: 1.0 = valid instance, 0.0 = padded; last 2 instances of
    # batch element 1 are padding.
    padding_masks = jnp.ones((B, N), jnp.float32)
    padding_masks = padding_masks.at[1, N - 2:].set(0.0)

    raw = _init_raw_params(kp)
    prepared = prepare_params(raw)   # one-time fold of calibration into heads

    out = calibrated_aggregator_forward(x, padding_masks, prepared)
    jax.block_until_ready(out)

    # shape checks
    assert out["backbone_embedding"].shape == (B, D)
    assert out["attn_scores"].shape == (B, N)
    assert set(out["heads_activations"].keys()) == {f"label_{i}" for i in range(NUM_HEADS)}
    for v in out["heads_activations"].values():
        assert v.shape == (B, C)

    # numerical check against pure-JAX reference (loose tol: approx reciprocal)
    ref_emb, ref_heads, ref_attn = _reference_forward(x, padding_masks, raw)
    assert jnp.allclose(out["attn_scores"], ref_attn, rtol=5e-3, atol=5e-3)
    assert jnp.allclose(out["backbone_embedding"], ref_emb, rtol=5e-3, atol=5e-3)
    for lbl in ref_heads:
        assert jnp.allclose(out["heads_activations"][lbl], ref_heads[lbl],
                            rtol=5e-3, atol=5e-3)

    print("KERNEL_OK")
</pallas_src>

<mosaic_0001>
module attributes {stable_mosaic.version = 11 : i64} {
  func.func @_calibrated_aggregator_kernel(%arg0: memref<2x8x32xf32, #tpu.memory_space<vmem>>, %arg1: memref<2x8xf32, #tpu.memory_space<vmem>>, %arg2: memref<32x16xf32, #tpu.memory_space<vmem>>, %arg3: memref<1x16xf32, #tpu.memory_space<vmem>>, %arg4: memref<32x8xf32, #tpu.memory_space<vmem>>, %arg5: memref<1x8xf32, #tpu.memory_space<vmem>>, %arg6: memref<2x32xf32, #tpu.memory_space<vmem>>, %arg7: memref<2x8xf32, #tpu.memory_space<vmem>>, %arg8: memref<2x8xf32, #tpu.memory_space<vmem>>) attributes {dimension_semantics = [], scalar_prefetch = 0 : i64, scratch_operands = 0 : i64, tpu.core_type = #tpu.core_type<tc>} {
    %c0 = arith.constant 0 : index
    %c0_0 = arith.constant 0 : index
    %c0_1 = arith.constant 0 : index
    %0 = vector.load %arg0[%c0, %c0_0, %c0_1] : memref<2x8x32xf32, #tpu.memory_space<vmem>>, vector<2x8x32xf32>
    %c0_2 = arith.constant 0 : index
    %c0_3 = arith.constant 0 : index
    %1 = vector.load %arg1[%c0_2, %c0_3] : memref<2x8xf32, #tpu.memory_space<vmem>>, vector<2x8xf32>
    %c0_4 = arith.constant 0 : index
    %c0_5 = arith.constant 0 : index
    %2 = vector.load %arg2[%c0_4, %c0_5] : memref<32x16xf32, #tpu.memory_space<vmem>>, vector<32x16xf32>
    "tpu.trace_start"() <{level = 10 : i32, message = "bnd,dh->bnh"}> : () -> ()
    %cst = arith.constant dense<0.000000e+00> : vector<2x8x16xf32>
    %3 = tpu.matmul %0, %2, %cst {dimension_numbers = #tpu.dot_dimension_numbers<[2], [0], [0, 1], [1], [0, 0, 0, 1, 1, 1], [], []>} : vector<2x8x32xf32>, vector<32x16xf32>, vector<2x8x16xf32> -> vector<2x8x16xf32>
    "tpu.trace_stop"() : () -> ()
    %4 = math.tanh %3 : vector<2x8x16xf32>
    %c0_6 = arith.constant 0 : index
    %c0_7 = arith.constant 0 : index
    %5 = vector.load %arg3[%c0_6, %c0_7] : memref<1x16xf32, #tpu.memory_space<vmem>>, vector<1x16xf32>
    %6 = vector.shape_cast %5 : vector<1x16xf32> to vector<1x1x16xf32>
    %7 = vector.broadcast %6 : vector<1x1x16xf32> to vector<2x8x16xf32>
    %8 = arith.mulf %4, %7 : vector<2x8x16xf32>
    %cst_8 = arith.constant dense<0.000000e+00> : vector<2x8xf32>
    %9 = vector.multi_reduction <add>, %8, %cst_8 [2] : vector<2x8x16xf32> to vector<2x8xf32>
    %cst_9 = arith.constant 0.000000e+00 : f32
    %10 = vector.broadcast %cst_9 : f32 to vector<2x8xf32>
    %11 = arith.cmpf ogt, %1, %10 : vector<2x8xf32>
    %cst_10 = arith.constant -1.000000e+30 : f32
    %12 = vector.broadcast %cst_10 : f32 to vector<2x8xf32>
    %13 = arith.select %11, %9, %12 : vector<2x8xi1>, vector<2x8xf32>
    %cst_11 = arith.constant dense<0xFF800000> : vector<2xf32>
    %14 = vector.multi_reduction <maximumf>, %13, %cst_11 [1] : vector<2x8xf32> to vector<2xf32>
    %15 = vector.shape_cast %14 : vector<2xf32> to vector<2x1xf32>
    %16 = vector.broadcast %15 : vector<2x1xf32> to vector<2x8xf32>
    %17 = arith.subf %13, %16 : vector<2x8xf32>
    %18 = math.exp %17 : vector<2x8xf32>
    %cst_12 = arith.constant dense<0.000000e+00> : vector<2xf32>
    %19 = vector.multi_reduction <add>, %18, %cst_12 [1] : vector<2x8xf32> to vector<2xf32>
    %20 = vector.shape_cast %19 : vector<2xf32> to vector<2x1xf32>
    %21 = tpu.reciprocal %20 {approx = true} : vector<2x1xf32> -> vector<2x1xf32>
    %22 = vector.broadcast %21 : vector<2x1xf32> to vector<2x8xf32>
    %23 = arith.mulf %18, %22 : vector<2x8xf32>
    %c0_13 = arith.constant 0 : index
    %c0_14 = arith.constant 0 : index
    %24 = vector.load %arg8[%c0_13, %c0_14] : memref<2x8xf32, #tpu.memory_space<vmem>>, vector<2x8xf32>
    tpu.vector_store %arg8[%c0_13, %c0_14], %23 {strides = array<i32>} : memref<2x8xf32, #tpu.memory_space<vmem>>, vector<2x8xf32>,
    %25 = vector.shape_cast %23 : vector<2x8xf32> to vector<2x8x1xf32>
    %26 = vector.broadcast %25 : vector<2x8x1xf32> to vector<2x8x32xf32>
    %27 = arith.mulf %26, %0 : vector<2x8x32xf32>
    %cst_15 = arith.constant dense<0.000000e+00> : vector<2x32xf32>
    %28 = vector.multi_reduction <add>, %27, %cst_15 [1] : vector<2x8x32xf32> to vector<2x32xf32>
    %c0_16 = arith.constant 0 : index
    %c0_17 = arith.constant 0 : index
    %29 = vector.load %arg6[%c0_16, %c0_17] : memref<2x32xf32, #tpu.memory_space<vmem>>, vector<2x32xf32>
    tpu.vector_store %arg6[%c0_16, %c0_17], %28 {strides = array<i32>} : memref<2x32xf32, #tpu.memory_space<vmem>>, vector<2x32xf32>,
    %c0_18 = arith.constant 0 : index
    %c0_19 = arith.constant 0 : index
    %30 = vector.load %arg4[%c0_18, %c0_19] : memref<32x8xf32, #tpu.memory_space<vmem>>, vector<32x8xf32>
    %cst_20 = arith.constant dense<0.000000e+00> : vector<2x8xf32>
    %31 = tpu.matmul %28, %30, %cst_20 {dimension_numbers = #tpu.dot_dimension_numbers<[1], [0], [0], [1], [0, 0, 1, 1], [], []>} : vector<2x32xf32>, vector<32x8xf32>, vector<2x8xf32> -> vector<2x8xf32>
    %c0_21 = arith.constant 0 : index
    %c0_22 = arith.constant 0 : index
    %32 = vector.load %arg5[%c0_21, %c0_22] : memref<1x8xf32, #tpu.memory_space<vmem>>, vector<1x8xf32>
    %33 = vector.broadcast %32 : vector<1x8xf32> to vector<2x8xf32>
    %34 = arith.addf %31, %33 : vector<2x8xf32>
    %c0_23 = arith.constant 0 : index
    %c0_24 = arith.constant 0 : index
    %35 = vector.load %arg7[%c0_23, %c0_24] : memref<2x8xf32, #tpu.memory_space<vmem>>, vector<2x8xf32>
    tpu.vector_store %arg7[%c0_23, %c0_24], %34 {strides = array<i32>} : memref<2x8xf32, #tpu.memory_space<vmem>>, vector<2x8xf32>,
    return
  }
}

</mosaic_0001>

<bundles_post_ra>
// kernel: tpu_custom_call.1
= control target key start
LH: loop header
LB: loop body
LE: loop exit
PB: predicated region body
PF: predicated region fallthrough
CT: control target
= control target key end

     0   :  { %14 = vsyncpa [#allocation3], 0  ;;  %s431_s0 = inlined_call_operand.vmem [shape: f32[2,8,32], index: 0, kind: input, shape index: {}]   ;;  %s432_s1 = inlined_call_operand.vmem [shape: f32[2,8], index: 1, kind: input, shape index: {}]   ;;  %s433_s2 = inlined_call_operand.vmem [shape: f32[32,16], index: 2, kind: input, shape index: {}]   ;;  %s434_s3 = inlined_call_operand.vmem [shape: f32[1,16], index: 3, kind: input, shape index: {}]   ;;  %s435_s4 = inlined_call_operand.vmem [shape: f32[32,8], index: 4, kind: input, shape index: {}]   ;;  %s436_s5 = inlined_call_operand.vmem [shape: f32[1,8], index: 5, kind: input, shape index: {}]   ;;  %s437_s6 = inlined_call_operand.hbm [shape: f32[2,32], index: 6, kind: output, shape index: {0}]   ;;  %s438_s7 = inlined_call_operand.hbm [shape: f32[2,8], index: 7, kind: output, shape index: {1}]   ;;  %s439_s8 = inlined_call_operand.hbm [shape: f32[2,8], index: 8, kind: output, shape index: {2}]  }
   0x1   :  { %v34_v0 = vld [vmem:[%s433_s2 + $0x18] sm:$0xff]  ;;  %v33_v1 = vld [vmem:[%s433_s2 + $0x10] sm:$0xff]  ;;  %v32_v2 = vld [vmem:[%s433_s2 + $0x8] sm:$0xff] }
   0x2   :  { %54 = vmatpush.msra.mxu0 %v34_v0  ;;  %221 = vmatpush.msra.mxu2 %v34_v0 }
   0x3   :  { %15 = vsyncpa [#allocation5], 0  ;;  %v31_v3 = vld [vmem:[%s433_s2] sm:$0xff]  ;;  %vm35_vm0 = vcmask 261120   ;;  %v384_v5 = vld [vmem:[%s431_s0 + $0x8] sm:$0xff]  ;;  %vm73_vm1 = vcmask 130048   ;;  %v83_v16 = vlaneseq }
   0x4   :  { %55 = vmatpush.msra.mxu0 %v33_v1  ;;  %222 = vmatpush.msra.mxu2 %v33_v1  ;;  %v379_v4 = vld [vmem:[%s431_s0] sm:$0xff]  ;;  %vm87_vm2 = vcmask 1041409   ;;  %vm91_vm4 = vcmask 58368   ;;  %v143_v36 = vld [vmem:[%s435_s4 + $0x18] sm:$0xff]  ;;  %v142_v37 = vld [vmem:[%s435_s4 + $0x10] sm:$0xff]  ;;  %vm138_vm5 = vcmask 254976  }
   0x5   :  { %v230_v7 = vld [vmem:[%s434_s3] ss:$0 sm:$0xff]  ;;  %v84_v17 = vand.u32 127, %v83_v16  ;;  %v106_v30 = vshrl.u32 %v83_v16, 7  ;;  %162 = vmatpush.msra.mxu1 %v143_v36  ;;  %v141_v38 = vld [vmem:[%s435_s4 + $0x8] sm:$0xff]  ;;  %s178_s26 = sshll.u32 %s437_s6, 4  ;;  %s179_s26 = int_to_ptr.hbm [resolvable:$true] %s178_s26 }
   0x6   :  { %56 = vmatpush.msra.mxu0 %v32_v2  ;;  %223 = vmatpush.msra.mxu2 %v32_v2  ;;  %v30_v18 = vld [vmem:[%s432_s1] sm:$0x3]  ;;  %s316_s27 = smov [#allocation2]   ;;  %s317_s9 = smov [#allocation4]  }
   0x7   :  { %vm80_vm3 = vcmp.gt.f32.partialorder %v30_v18, 0.0  ;;  %228 = vset.pattern.permute.xlu2 %v106_v30  ;;  %229 = vset.pattern.permute.xlu0 %v106_v30  ;;  %v140_v39 = vld [vmem:[%s435_s4] sm:$0xff]  ;;  %s176_s28 = sshll.u32 %s316_s27, 4  ;;  %s187_s10 = sshll.u32 %s317_s9, 4  ;;  %s177_s28 = int_to_ptr.vmem [resolvable:$true] %s176_s28  ;;  %s188_s10 = int_to_ptr.vmem [resolvable:$true] %s187_s10 }
   0x8   :  { %57 = vmatpush.msra.mxu0 %v31_v3  ;;  %224 = vmatpush.msra.mxu2 %v31_v3  ;;  %v231_v59 = vld [vmem:[%s436_s5] ss:$0 sm:$0xff]  ;;  %s189_s13 = sshll.u32 %s438_s7, 4  ;;  %s318_s14 = smov [#allocation6]   ;;  %s190_s13 = int_to_ptr.hbm [resolvable:$true] %s189_s13 }
   0x9   :  { %218 = vmatmul.msk.f32.vlgmr.msra.gmra.mxu0 %vm35_vm0, %v379_v4  ;;  %219 = vmatmul.msk.f32.vlgmr.msra.gmra.mxu2 %vm35_vm0, %v384_v5  ;;  %s198_s15 = sshll.u32 %s318_s14, 4  ;;  %s200_s6 = sshll.u32 %s439_s8, 4  ;;  %s199_s15 = int_to_ptr.vmem [resolvable:$true] %s198_s15  ;;  %s201_s6 = int_to_ptr.hbm [resolvable:$true] %s200_s6 }
   0xa   :  { %163 = vmatpush.msra.mxu1 %v142_v37 }
   0xc   :  { %164 = vmatpush.msra.mxu1 %v141_v38 }
   0xe   :  { %165 = vmatpush.msra.mxu1 %v140_v39 }
  0x86   :  { %v59_v6 = vpop.f32.mrf.mxu0 }
  0x87   :  { %232 = vtanh.f32 %v59_v6 }
  0x8c   :  { %v62_v8 = vpop.f32.mrf.mxu2 }
  0x8d   :  { %v233_v9 = vpop.eup %232  ;;  %234 = vtanh.f32 %v62_v8 }
  0x8e   :  { %v71_v10 = vmul.f32 %v233_v9, %v230_v7 }
  0x90   :  { %v74_v11 = vsel %vm73_vm1, %v71_v10, 0.0 }
  0x91   :  { %75 = vadd.xlane.f32.xlu0 %v74_v11 }
  0x93   :  { %v235_v12 = vpop.eup %234 }
  0x94   :  { %v72_v13 = vmul.f32 %v235_v12, %v230_v7 }
  0x96   :  { %v77_v14 = vsel %vm73_vm1, %v72_v13, 0.0 }
  0x99   :  { %78 = vadd.xlane.f32.xlu0 %v77_v14 }
 0x104   :  { %v76_v15 = vpop.xlane.xlu0 %75 }
 0x105   :  { %v85_v20 = vperm.slane %v76_v15, %v84_v17 }
 0x10c   :  { %v79_v19 = vpop.xlane.xlu0 %78 }
 0x10d   :  { %v86_v21 = vperm.slane %v79_v19, %v84_v17 }
 0x10f   :  { %v88_v22 = vsel %vm87_vm2, %v86_v21, %v85_v20 }
 0x110   :  { %v90_v23 = vsel %vm80_vm3, %v88_v22, -1e+30 }
 0x111   :  { %v92_v24 = vsel %vm91_vm4, %v90_v23, -inf }
 0x112   :  { %93 = vmax.xlane.f32.xlu1 %v92_v24 }
 0x185   :  { %v94_v25 = vpop.xlane.xlu1 %93 }
 0x186   :  { %v95_v26 = vsub.f32 %v90_v23, %v94_v25 }
 0x188   :  { %v96_v27 = vmul.f32 1.442695, %v95_v26 }
 0x18a   :  { %236 = vpow2.f32 %v96_v27 }
 0x190   :  { %v237_v28 = vpop.eup %236 }
 0x191   :  { %v98_v29 = vsel %vm91_vm4, %v237_v28, 0.0 }
 0x192   :  { %99 = vadd.xlane.f32.xlu1 %v98_v29 }
 0x205   :  { %v100_v31 = vpop.xlane.xlu1 %99 }
 0x206   :  { %238 = vrcp.f32 %v100_v31 }
 0x20c   :  { %v239_v32 = vpop.eup %238 }
 0x20d   :  { %v102_v33 = vmul.f32 %v239_v32, %v237_v28 }
 0x20f   :  { %v104_v34 = vperm.slane %v102_v33, 0  ;;  %103 = vst.msk [vmem:[#allocation6] sm:$0x3] %vm91_vm4, %v102_v33  ;;  %v111_v35 = vperm.slane %v102_v33, 1 }
 0x211   :  { %109 = vperm.xlu2 %228, %v104_v34  }
 0x219   :  { %116 = vperm.xlu2 %228, %v111_v35  }
 0x26b   :  { %v110_v40 = vpop.permute.xlu2 %109 }
 0x26c   :  { %v118_v41 = vmul.f32 %v110_v40, %v379_v4 }
 0x26e   :  { %v120_v42 = vsel %vm35_vm0, %v118_v41, 0.0 }
 0x26f   :  { %v121_v43 = vrot.slane %v120_v42, 4 }
 0x271   :  { %v122_v44 = vadd.f32 %v121_v43, %v120_v42 }
 0x273   :  { %v117_v45 = vpop.permute.xlu2 %116  ;;  %v123_v47 = vrot.slane %v122_v44, 2 }
 0x274   :  { %v119_v46 = vmul.f32 %v117_v45, %v384_v5 }
 0x275   :  { %v124_v50 = vadd.f32 %v123_v47, %v122_v44 }
 0x276   :  { %v127_v48 = vsel %vm35_vm0, %v119_v46, 0.0 }
 0x277   :  { %v128_v49 = vrot.slane %v127_v48, 4  ;;  %v125_v53 = vrot.slane %v124_v50, 1 }
 0x279   :  { %v129_v51 = vadd.f32 %v128_v49, %v127_v48  ;;  %v126_v56 = vadd.f32 %v125_v53, %v124_v50 }
 0x27b   :  { %v130_v52 = vrot.slane %v129_v51, 2 }
 0x27d   :  { %v131_v54 = vadd.f32 %v130_v52, %v129_v51 }
 0x27f   :  { %v132_v55 = vrot.slane %v131_v54, 1 }
 0x281   :  { %v133_v57 = vadd.f32 %v132_v55, %v131_v54 }
 0x283   :  { %v136_v58 = vsel %vm87_vm2, %v133_v57, %v126_v56 }
 0x284   :  { %220 = vmatmul.msk.f32.vlgmr.msra.gmra.mxu1 %vm35_vm0, %v136_v58  ;;  %139 = vst.msk [vmem:[#allocation2] sm:$0x3] %vm138_vm5, %v136_v58 }
 0x285   :  { %181 = dma.vmem_to_hbm [thread:$0]  %s177_s28, 32, %s179_s26, [#allocation3]  }
 0x301   :  { %v167_v60 = vpop.f32.mrf.mxu1 }
 0x302   :  { %v168_v61 = vadd.f32 %v231_v59, %v167_v60 }
 0x304   :  { %170 = vst.msk [vmem:[#allocation4] sm:$0x3] %vm91_vm4, %v168_v61 }
 0x305   :  { %192 = dma.vmem_to_hbm [thread:$0]  %s188_s10, 32, %s190_s13, [#allocation5]  }
 0x306   :  { %203 = dma.vmem_to_hbm [thread:$0]  %s199_s15, 32, %s201_s6, [#allocation5]  }
 0x307   :  { %312 = dma.done.wait [#allocation3], 32  }
 0x308   :  { %313 = vsyncadd [#allocation3], 4294967264 }
 0x309   :  { %314 = dma.done.wait [#allocation5], 64  }
 0x30a   :  { %315 = vsyncadd [#allocation5], 4294967232 }
 0x30b   :  { %216 = vsyncpa [#allocation3], 1 }
 0x30c   :  { %217 = vsyncpa [#allocation5], 1 }

</bundles_post_ra>
